<compile_context>
chip_gen: v7x
topology: tpu7x:2x2x1
jax: 0.10.0
libtpu: 0.0.40
codegen_flags: <defaults>
</compile_context>

<pallas_src>
import jax
import jax.numpy as jnp
from jax.experimental import pallas as pl
from jax.experimental.pallas import tpu as pltpu


def _topdown_lateral_kernel(lat_ref, top_ref, w_ref, e2_ref, b_ref, o_ref):
    # lat_ref: (1, C_lat, TM)     flattened lateral pixels of this tile
    # top_ref: (1, C_out, k, W)   top rows feeding this tile (not upsampled)
    # w_ref:   (C_out, C_lat)     squeezed 1x1 conv weight
    # e2_ref:  (W, 4W)            constant 0/1 column-duplication matrix
    # b_ref:   (C_out, 1)         bias (f32)
    # o_ref:   (1, C_out, TM)     TM = 4 * k * W  (= 2k output rows x 2W cols)
    c_out, k, w = top_ref.shape[1], top_ref.shape[2], top_ref.shape[3]
    tm = o_ref.shape[2]

    # 1x1 conv over the lateral tile: one lane-dense MXU matmul, f32 accumulate.
    acc = jnp.dot(w_ref[...], lat_ref[0], preferred_element_type=jnp.float32)

    # Fused 2x nearest upsample.  Output "double row" r (length 4W) equals
    # [out row 2r | out row 2r+1]; both halves are top row r with each column
    # duplicated, i.e. top_row @ E2 with E2[q, p] = (q == (p mod 2W) // 2).
    td = jnp.dot(top_ref[0].reshape(c_out * k, w), e2_ref[...],
                 preferred_element_type=jnp.float32)
    td = td.reshape(c_out, tm)

    o_ref[0] = (acc + td + b_ref[...]).astype(o_ref.dtype)


def _round_up(x, m):
    return (x + m - 1) // m * m


def _vmem_config():
    """(tile-picker working budget, vmem_limit_bytes), generation-aware."""
    try:
        cap = int(getattr(pltpu.get_tpu_info(), "vmem_capacity_bytes", 0)) or (64 << 20)
    except Exception:  # conservative default if the query is unavailable
        cap = 64 << 20
    if cap >= 96 << 20:            # v5e / v6e class (128 MiB physical VMEM)
        return 32 << 20, 64 << 20
    return 18 << 20, 48 << 20      # v7x class (64 MiB physical VMEM)


def _tile_footprint_bytes(k, w, c_lat, c_out, elem):
    """Conservative VMEM bytes for one grid step with k top rows per tile."""
    tm = 4 * k * w
    f32 = 4
    # Double-buffered pipelined tiles (lateral in, output, top in).
    lat_t = 2 * elem * _round_up(c_lat, 8) * tm
    out_t = 2 * elem * _round_up(c_out, 8) * tm
    top_t = 2 * elem * c_out * _round_up(k, 8) * _round_up(w, 128)
    # Grid-invariant operands (counted double-buffered to stay conservative;
    # they are tiny now, so this no longer limits the tile size).
    w_t = 2 * elem * _round_up(c_out, 8) * _round_up(c_lat, 128)
    e_t = 2 * elem * _round_up(w, 8) * _round_up(4 * w, 128)
    b_t = 2 * f32 * _round_up(c_out, 8) * 128
    # f32 intermediates materialized before the output cast (conv, td, slack).
    inter = 3 * f32 * c_out * tm
    return lat_t + out_t + top_t + w_t + e_t + b_t + inter


def _pick_rows_per_tile(n, h, w, c_lat, c_out, elem, budget_bytes, limit_bytes):
    """Pick k = top rows per tile.  One tile = 2k output rows x 2W cols.

    Legality (TPU BlockSpec (8,128) rule):
      * lat/out flat block last dim 4*k*w must be a multiple of 128, or k == h
        (block equals the full flattened axis);
      * top block second-to-last dim k must be a multiple of 8, or k == h.
    """
    legal = []
    for k in range(1, h + 1):
        if h % k:
            continue
        if k != h and k % 8:
            continue
        if k != h and (4 * k * w) % 128:
            continue
        legal.append(k)
    # k == h is always legal, so `legal` is never empty.

    fitting = [k for k in legal
               if _tile_footprint_bytes(k, w, c_lat, c_out, elem) <= budget_bytes]
    if not fitting:
        k0 = min(legal)
        if _tile_footprint_bytes(k0, w, c_lat, c_out, elem) <= limit_bytes - (4 << 20):
            return k0
        # TODO(synk): fall back to a 2-D (row-block, 128-multiple column-chunk)
        # spatial grid for awkward (H, W) where even the smallest legal tile
        # exceeds the scoped VMEM limit.
        raise ValueError(
            "topdown_lateral_pallas: no tile configuration fits in VMEM for "
            f"H={h}, W={w}, C_lat={c_lat}, C_out={c_out}.")

    min_steps = 4  # >= 2 TensorCores x 2 pipelined steps (v7x megacore + DMA overlap)

    def score(k):
        tm = 4 * k * w
        steps = n * (h // k)
        # 1) enough grid steps to keep both v7x TCs and the pipeline busy,
        # 2) lane count in the 1024-4096 sweet spot, 3) prefer ~2048 lanes.
        return (steps >= min_steps, 1024 <= tm <= 4096, -abs(tm - 2048))

    return max(fitting, key=score)


def topdown_lateral_pallas(top_blob, lateral_blob, weight, bias, *,
                           vmem_budget_bytes=None, vmem_limit_bytes=None):
    """top_blob: (N, C_top, H, W) NCHW; lateral_blob: (N, C_lat, 2H, 2W) NCHW.

    weight: (C_out, C_lat) squeezed 1x1 conv kernel; bias: (C_out,).
    Returns (N, C_out, 2H, 2W) NCHW with C_out == C_top.
    NOTE: for bf16 activations the final sum is rounded to bf16 (PyTorch keeps
    f32 throughout); accumulation itself is f32.
    """
    n, c_top, h, w = top_blob.shape
    n2, c_lat, h2, w2 = lateral_blob.shape
    assert n == n2 and h2 == 2 * h and w2 == 2 * w
    c_out = weight.shape[0]
    assert c_out == c_top and weight.shape == (c_out, c_lat)
    assert bias.shape == (c_out,)

    out_dtype = jnp.result_type(top_blob.dtype, lateral_blob.dtype)
    elem = jnp.dtype(out_dtype).itemsize

    auto_budget, auto_limit = _vmem_config()
    budget = auto_budget if vmem_budget_bytes is None else vmem_budget_bytes
    limit = auto_limit if vmem_limit_bytes is None else vmem_limit_bytes

    k = _pick_rows_per_tile(n, h, w, c_lat, c_out, elem, budget, limit)
    tm = 4 * k * w              # output lanes per tile (2k out rows x 2W cols)
    m2 = h2 * w2                # flattened output spatial size

    # Free reshape only (merging contiguous trailing dims) -- no transposes, and
    # the upsampled top is never materialized in HBM.
    lat_flat = lateral_blob.reshape(n, c_lat, m2)

    # Constants: weight in activation dtype (f32 accumulation via
    # preferred_element_type), bias in f32, E2 in the top dtype (0/1 entries are
    # exact in bf16 -> fast bf16 MXU path when activations are bf16).
    w_mat = weight.astype(lateral_blob.dtype)                 # (C_out, C_lat)
    b_mat = bias.astype(jnp.float32).reshape(c_out, 1)        # (C_out, 1)
    p = jnp.arange(4 * w)
    q = jnp.arange(w)
    e2 = (q[:, None] == (p[None, :] % (2 * w)) // 2).astype(top_blob.dtype)  # (W, 4W)

    grid = (n, h // k)

    flops = 2 * n * m2 * c_lat * c_out            # 1x1 conv
    flops += 2 * n * c_out * h * w * (4 * w)      # factored upsample matmul
    bytes_accessed = int(
        lat_flat.size * jnp.dtype(lat_flat.dtype).itemsize
        + top_blob.size * jnp.dtype(top_blob.dtype).itemsize
        + n * c_out * m2 * elem
        + w_mat.size * jnp.dtype(w_mat.dtype).itemsize
        + e2.size * jnp.dtype(e2.dtype).itemsize
        + b_mat.size * 4)
    cost = pl.CostEstimate(flops=int(flops), transcendentals=0,
                           bytes_accessed=bytes_accessed)

    out_flat = pl.pallas_call(
        _topdown_lateral_kernel,
        out_shape=jax.ShapeDtypeStruct((n, c_out, m2), out_dtype),
        grid=grid,
        in_specs=[
            pl.BlockSpec((1, c_lat, tm), lambda i, j: (i, 0, j)),
            pl.BlockSpec((1, c_out, k, w), lambda i, j: (i, 0, j, 0)),
            pl.BlockSpec((c_out, c_lat), lambda i, j: (0, 0)),
            pl.BlockSpec((w, 4 * w), lambda i, j: (0, 0)),
            pl.BlockSpec((c_out, 1), lambda i, j: (0, 0)),
        ],
        out_specs=pl.BlockSpec((1, c_out, tm), lambda i, j: (i, 0, j)),
        compiler_params=pltpu.CompilerParams(
            dimension_semantics=("parallel", "parallel"),
            vmem_limit_bytes=int(limit)),
        cost_estimate=cost,
    )(lat_flat, top_blob, w_mat, e2, b_mat)

    return out_flat.reshape(n, c_out, h2, w2)   # free reshape back to NCHW


def init_params(key, dim_in_top, dim_in_lateral):
    """Deterministic Xavier-uniform init matching nn.init.xavier_uniform_."""
    fan_in = dim_in_lateral * 1 * 1
    fan_out = dim_in_top * 1 * 1
    bound = (6.0 / (fan_in + fan_out)) ** 0.5
    weight = jax.random.uniform(
        key, (dim_in_top, dim_in_lateral), jnp.float32, minval=-bound, maxval=bound)
    bias = jnp.zeros((dim_in_top,), jnp.float32)
    return weight, bias


def reference(top_blob, lateral_blob, weight, bias):
    # pure-JAX reference for sanity checking
    lat = jnp.einsum("nchw,oc->nohw", lateral_blob, weight) + bias[None, :, None, None]
    td = jnp.repeat(jnp.repeat(top_blob, 2, axis=2), 2, axis=3)
    return lat + td


if __name__ == "__main__":
    key = jax.random.PRNGKey(0)
    k_w, k_top, k_lat = jax.random.split(key, 3)

    dim_in_top = 4       # C_out == C_top
    dim_in_lateral = 8
    N, H, W = 2, 16, 32  # top (2,4,16,32); lateral (2,8,32,64); out (2,4,32,64)

    weight, bias = init_params(k_w, dim_in_top, dim_in_lateral)
    top_blob = jax.random.normal(k_top, (N, dim_in_top, H, W), jnp.float32)
    lateral_blob = jax.random.normal(k_lat, (N, dim_in_lateral, 2 * H, 2 * W), jnp.float32)

    out = topdown_lateral_pallas(top_blob, lateral_blob, weight, bias)
    out = jax.block_until_ready(out)

    ref = reference(top_blob, lateral_blob, weight, bias)
    assert out.shape == (N, dim_in_top, 2 * H, 2 * W)
    assert jnp.allclose(out, ref, atol=1e-5, rtol=1e-5)

    print("KERNEL_OK")
</pallas_src>

<mosaic_0001>
module attributes {stable_mosaic.version = 11 : i64} {
  func.func @_topdown_lateral_kernel(%arg0: i32, %arg1: i32, %arg2: memref<1x8x1024xf32, #tpu.memory_space<vmem>>, %arg3: memref<1x4x8x32xf32, #tpu.memory_space<vmem>>, %arg4: memref<4x8xf32, #tpu.memory_space<vmem>>, %arg5: memref<32x128xf32, #tpu.memory_space<vmem>>, %arg6: memref<4x1xf32, #tpu.memory_space<vmem>>, %arg7: memref<1x4x1024xf32, #tpu.memory_space<vmem>>) attributes {dimension_semantics = [#tpu.dimension_semantics<parallel>, #tpu.dimension_semantics<parallel>], iteration_bounds = array<i64: 2, 2>, scalar_prefetch = 0 : i64, scratch_operands = 0 : i64, tpu.core_type = #tpu.core_type<tc>, window_params = [{transform_indices = @transform_0, window_bounds = array<i64: 1, 8, 1024>}, {transform_indices = @transform_1, window_bounds = array<i64: 1, 4, 8, 32>}, {pipeline_mode = #tpu.pipeline_mode<synchronous>, transform_indices = @transform_2, window_bounds = array<i64: 4, 8>}, {pipeline_mode = #tpu.pipeline_mode<synchronous>, transform_indices = @transform_3, window_bounds = array<i64: 32, 128>}, {pipeline_mode = #tpu.pipeline_mode<synchronous>, transform_indices = @transform_4, window_bounds = array<i64: 4, 1>}, {transform_indices = @transform_5, window_bounds = array<i64: 1, 4, 1024>}]} {
    %c0 = arith.constant 0 : index
    %c0_0 = arith.constant 0 : index
    %0 = vector.load %arg4[%c0, %c0_0] : memref<4x8xf32, #tpu.memory_space<vmem>>, vector<4x8xf32>
    %c0_1 = arith.constant 0 : index
    %c0_2 = arith.constant 0 : index
    %c0_3 = arith.constant 0 : index
    %1 = vector.load %arg2[%c0_1, %c0_2, %c0_3] : memref<1x8x1024xf32, #tpu.memory_space<vmem>>, vector<1x8x1024xf32>
    %2 = vector.shape_cast %1 : vector<1x8x1024xf32> to vector<8x1024xf32>
    %cst = arith.constant dense<0.000000e+00> : vector<4x1024xf32>
    %3 = tpu.matmul %0, %2, %cst {dimension_numbers = #tpu.dot_dimension_numbers<[1], [0], [0], [1], [0, 0, 1, 1], [], []>} : vector<4x8xf32>, vector<8x1024xf32>, vector<4x1024xf32> -> vector<4x1024xf32>
    %c0_4 = arith.constant 0 : index
    %c0_5 = arith.constant 0 : index
    %c0_6 = arith.constant 0 : index
    %c0_7 = arith.constant 0 : index
    %4 = vector.load %arg3[%c0_4, %c0_5, %c0_6, %c0_7] : memref<1x4x8x32xf32, #tpu.memory_space<vmem>>, vector<1x4x8x32xf32>
    %5 = vector.shape_cast %4 : vector<1x4x8x32xf32> to vector<4x8x32xf32>
    %6 = vector.shape_cast %5 : vector<4x8x32xf32> to vector<32x32xf32>
    %c0_8 = arith.constant 0 : index
    %c0_9 = arith.constant 0 : index
    %7 = vector.load %arg5[%c0_8, %c0_9] : memref<32x128xf32, #tpu.memory_space<vmem>>, vector<32x128xf32>
    %cst_10 = arith.constant dense<0.000000e+00> : vector<32x128xf32>
    %8 = tpu.matmul %6, %7, %cst_10 {dimension_numbers = #tpu.dot_dimension_numbers<[1], [0], [0], [1], [0, 0, 1, 1], [], []>} : vector<32x32xf32>, vector<32x128xf32>, vector<32x128xf32> -> vector<32x128xf32>
    %9 = vector.shape_cast %8 : vector<32x128xf32> to vector<4x1024xf32>
    %10 = arith.addf %3, %9 : vector<4x1024xf32>
    %c0_11 = arith.constant 0 : index
    %c0_12 = arith.constant 0 : index
    %11 = vector.load %arg6[%c0_11, %c0_12] : memref<4x1xf32, #tpu.memory_space<vmem>>, vector<4x1xf32>
    %12 = vector.broadcast %11 : vector<4x1xf32> to vector<4x1024xf32>
    %13 = arith.addf %10, %12 : vector<4x1024xf32>
    %c0_13 = arith.constant 0 : index
    %c0_14 = arith.constant 0 : index
    %c0_15 = arith.constant 0 : index
    %14 = vector.load %arg7[%c0_13, %c0_14, %c0_15] : memref<1x4x1024xf32, #tpu.memory_space<vmem>>, vector<1x4x1024xf32>
    %15 = vector.shape_cast %14 : vector<1x4x1024xf32> to vector<4x1024xf32>
    %16 = vector.shape_cast %13 : vector<4x1024xf32> to vector<1x4x1024xf32>
    tpu.vector_store %arg7[%c0_13, %c0_14, %c0_15], %16 {strides = array<i32>} : memref<1x4x1024xf32, #tpu.memory_space<vmem>>, vector<1x4x1024xf32>,
    return
  }
  func.func @transform_0(%arg0: i32, %arg1: i32) -> (i32, i32, i32) {
    %c0_i32 = arith.constant 0 : i32
    %c0_i32_0 = arith.constant 0 : i32
    return %arg0, %c0_i32, %arg1 : i32, i32, i32
  }
  func.func @transform_1(%arg0: i32, %arg1: i32) -> (i32, i32, i32, i32) {
    %c0_i32 = arith.constant 0 : i32
    %c0_i32_0 = arith.constant 0 : i32
    %c0_i32_1 = arith.constant 0 : i32
    return %arg0, %c0_i32, %arg1, %c0_i32_0 : i32, i32, i32, i32
  }
  func.func @transform_2(%arg0: i32, %arg1: i32) -> (i32, i32) {
    %c0_i32 = arith.constant 0 : i32
    %c0_i32_0 = arith.constant 0 : i32
    %c0_i32_1 = arith.constant 0 : i32
    return %c0_i32, %c0_i32_0 : i32, i32
  }
  func.func @transform_3(%arg0: i32, %arg1: i32) -> (i32, i32) {
    %c0_i32 = arith.constant 0 : i32
    %c0_i32_0 = arith.constant 0 : i32
    %c0_i32_1 = arith.constant 0 : i32
    return %c0_i32, %c0_i32_0 : i32, i32
  }
  func.func @transform_4(%arg0: i32, %arg1: i32) -> (i32, i32) {
    %c0_i32 = arith.constant 0 : i32
    %c0_i32_0 = arith.constant 0 : i32
    %c0_i32_1 = arith.constant 0 : i32
    return %c0_i32, %c0_i32_0 : i32, i32
  }
  func.func @transform_5(%arg0: i32, %arg1: i32) -> (i32, i32, i32) {
    %c0_i32 = arith.constant 0 : i32
    %c0_i32_0 = arith.constant 0 : i32
    return %arg0, %c0_i32, %arg1 : i32, i32, i32
  }
}

</mosaic_0001>

<bundles_post_ra>
// kernel: tpu_custom_call.1
= control target key start
LH: loop header
LB: loop body
LE: loop exit
PB: predicated region body
PF: predicated region fallthrough
CT: control target
= control target key end

     0   :  { %s1693_s0 = inlined_call_operand.hbm [shape: f32[2,8,2048], index: 0, kind: input, shape index: {}]   ;;  %s1694_s1 = inlined_call_operand.hbm [shape: f32[2,4,16,32], index: 1, kind: input, shape index: {}]   ;;  %s1695_s2 = inlined_call_operand.vmem [shape: f32[4,8], index: 2, kind: input, shape index: {}]   ;;  %s1696_s3 = inlined_call_operand.hbm [shape: f32[32,128], index: 3, kind: input, shape index: {}]   ;;  %s1697_s4 = inlined_call_operand.vmem [shape: f32[4,1], index: 4, kind: input, shape index: {}]   ;;  %s1698_s5 = inlined_call_operand.hbm [shape: f32[2,4,2048], index: 5, kind: output, shape index: {}]  }
   0x1   :  { %1711 = sst [smem:[#allocation18_spill]] %s1696_s3 }
   0x2   :  { %1712 = sst [smem:[#allocation19_spill]] %s1698_s5 }
   0x3   :  { %10 = vsyncpa [#allocation3], 0 }
   0x4   :  { %12 = vsyncpa [#allocation3 + $0x1], 0 }
   0x5   :  { %13 = vsyncpa [#allocation6], 0 }
   0x6   :  { %15 = vsyncpa [#allocation6 + $0x1], 0 }
   0x7   :  { %16 = vsyncpa [#allocation4], 0 }
   0x8   :  { %18 = vsyncpa [#allocation4 + $0x1], 0  ;;  %s1371_s18 = smov 0   ;;  %s1373_s19 = smov 0  }
   0x9   :  { %s1375_s20 = smov 0   ;;  %s1377_s21 = smov 0  }
   0xa   :  { %s1379_s22 = smov 0   ;;  %s1381_s23 = smov 0  }
   0xb   :  { %s1383_s24 = smov 0   ;;  %s1385_s25 = smov 0  }
   0xc LB: > { %1713 = sst [smem:[#allocation13_spill]] %s1301_s18  ;;  %s1412_s26 = sadd.s32 4294967295, %s1329_s25   ;;  %s1329_s25 = sphi %s1385_s25, %s24_s25   ;;  %s1325_s24 = sphi %s1383_s24, %s1746_s24   ;;  %s1321_s23 = sphi %s1381_s23, %s1745_s23   ;;  %s1317_s22 = sphi %s1379_s22, %s1744_s22   ;;  %s1313_s21 = sphi %s1377_s21, %s1743_s21   ;;  %s1309_s20 = sphi %s1375_s20, %s1742_s20   ;;  %s1305_s19 = sphi %s1373_s19, %s1741_s19   ;;  %s1301_s18 = sphi %s1371_s18, %s1740_s18  }
   0xd   : > { %s974_s27 = sadd.s32 4294967294, %s1329_s25   ;;  %p58_p0 = scmp.ne.s32.totalorder %s1305_s19, %s1301_s18 }
   0xe   : > { %p1699_p1 = scmp.eq.s32.totalorder %s1412_s26, 0  ;;  %p181_p3 = scmp.eq.s32.totalorder %s974_s27, 3 }
   0xf   : > { %p975_p5 = scmp.ge.s32.totalorder %s1329_s25, 1  ;;  %p188_p7 = scmp.lt.s32.totalorder %s1329_s25, 5 }
  0x10   : > { %p1421_p4 = por %p1699_p1, %p58_p0  ;;  %p1426_p6 = por %p181_p3, %p58_p0 }
  0x11   : > { %p1431_p8 = pnand %p975_p5, %p188_p7  ;;  %s1331_s6 = smov [#allocation7]  }
  0x12   : > { %s1714_s28 = scalar_select %p1421_p4, 1, 0 }
  0x13   : > { %s1715_s29 = scalar_select %p1426_p6, 1, 0 }
  0x14   : > { %s1717_s30 = scalar_select %p1431_p8, 1, 0 }
  0x15   : > { %1716 = sst [smem:[#allocation14_spill]] %s1715_s29  ;;  %s203_s7 = sshll.u32 %s1331_s6, 4  ;;  %s204_s7 = int_to_ptr.vmem [resolvable:$true] %s203_s7 }
  0x16   : > { %p1044_p9 = pneg %p1431_p8  ;;  %s1719_s3 = sld [smem:[#allocation18_spill]] }
  0x18   : > { %p1439_p10 = pnand %p1044_p9, %p1699_p1 }
  0x1a   : > { %p1137_p12 = pneg %p1439_p10 }
  0x1c   : > { %s1135_s11 = scalar_lea.hbm %s1719_s3, 512 }
  0x1d   : > { %p1136_p11 = scmp.ne.s32.totalorder %s1719_s3, %s1135_s11  ;;  %p1142_p3 = scmp.lt.u32.totalorder %s1135_s11, %s1719_s3 }
  0x1f   : > { %p1138_p13 = pnand %p1137_p12, %p1136_p11 }
  0x21   : > { %p1139_p0 = pneg %p1138_p13 }
  0x23   : > { %p1144_p5 = pnand %p1142_p3, %p1139_p0 }
  0x25   : > { %1147 = shalt.err (!%p1144_p5)
}
  0x26   : > { %s1148_s16 = scalar_lea.vmem %s204_s7, 512  ;;  %p1156_p2 = scmp.lt.s32.totalorder %s204_s7, %s204_s7 }
  0x27   : > { %p1149_p7 = scmp.ne.s32.totalorder %s204_s7, %s1148_s16  ;;  %p1157_p6 = scmp.lt.s32.totalorder %s1148_s16, %s1148_s16 }
  0x29   : > { %p1151_p9 = pnand %p1149_p7, %p1137_p12  ;;  %p1158_p4 = por %p1157_p6, %p1156_p2 }
  0x2b   : > { %p1152_p1 = pneg %p1151_p9 }
  0x2d   : > { %p1159_p8 = pnand %p1158_p4, %p1152_p1 }
  0x2f   : > { %1162 = shalt.err (!%p1159_p8)
}
  0x30   : > { %s1702_s17 = smov 128   ;;  %s1703_s27 = smov 8  }
  0x31   : > { %1047 = dma.hbm_to_vmem [thread:$0]  (!%p1439_p10), %s1719_s3, 512, %s204_s7, [#allocation6], %s1702_s17, %s1702_s17, %s1703_s27  }
  0x32   : > { %s33_s10 = sadd.s32 1, %s1321_s23  ;;  %s36_s11 = sadd.s32 1, %s1325_s24 }
  0x33   : > { %p34_p1 = scmp.ge.s32.totalorder %s33_s10, 2  ;;  %s45_s12 = sadd.s32 1, %s1309_s20 }
  0x34   : > { %p52_p2 = scmp.ne.s32.totalorder %s1309_s20, %s1305_s19  ;;  %p53_p4 = scmp.eq.s32.totalorder %s1329_s25, 0 }
  0x35   : > { %s1748_s10 = smov (%p34_p1, %s33_s10), 0  ;;  %s1750_s11 = smov (!%p34_p1, %s36_s11), %s1325_s24 }
  0x36   : > { %1720 = sst [smem:[#allocation15_spill]] %s1748_s10  ;;  %s41_s8 = ssub.s32 %s1321_s23, %s1748_s10 }
  0x37   : > { %p38_p6 = scmp.ge.s32.totalorder %s1750_s11, 2  ;;  %p1721_p8 = scmp.eq.s32.totalorder %s1412_s26, 3 }
  0x38   : > { %p1479_p10 = por %p53_p4, %p52_p2  ;;  %p1060_p12 = scmp.lt.s32.totalorder %s1329_s25, 4 }
  0x39   : > { %p1475_p11 = por %p1721_p8, %p52_p2  ;;  %s1752_s11 = smov (%p38_p6, %s1750_s11), 0 }
  0x3a   : > { %1725 = sst [smem:[#allocation17_spill]] %s1752_s11  ;;  %s1487_s14 = sand.u32 1, %s1309_s20  }
  0x3b   : > { %s1722_s13 = scalar_select %p1475_p11, 1, 0 }
  0x3c   : > { %s979_s15 = sshll.u32 %s1321_s23, 3  ;;  %s40_s16 = ssub.s32 %s1325_s24, %s1752_s11 }
  0x3d   : > { %1723 = sst [smem:[#allocation16_spill]] %s1722_s13  ;;  %s42_s6 = sor.u32 %s41_s8, %s40_s16 }
  0x3e   : > { %s978_s9 = sshll.u32 %s1487_s14, 6  ;;  %p43_p13 = scmp.eq.s32.totalorder %s42_s6, 0 }
  0x3f   : > { %s980_s17 = sshll.u32 %s1325_s24, 4  ;;  %s224_s27 = scalar_lea.vmem [#allocation2], %s978_s9 }
  0x40   : > { %s234_s3 = sshll.u32 %s224_s27, 4  ;;  %s230_s29 = sadd.s32 %s980_s17, %s979_s15  ;;  %s1497_s3 = int_to_ptr.vmem [resolvable:$true] %s234_s3 }
  0x41   : > { %s1495_s10 = scalar_select %p43_p13, %s1309_s20, %s45_s12  }
  0x42   : > { %s981_s18 = sshll.u32 %s230_s29, 7  ;;  %p1503_p0 = pnand %p1060_p12, %p1479_p10 }
  0x43   : > { %s1510_s8 = scalar_lea.hbm %s1693_s0, %s981_s18  ;;  %s982_s17 = sshll.u32 %s1487_s14, 5 }
  0x44   : > { %s221_s27 = scalar_lea.sflag [#allocation3], %s1487_s14  ;;  %s1163_s29 = scalar_lea.hbm %s1510_s8, 1024 }
  0x45   : > { %p1164_p3 = scmp.ne.s32.totalorder %s1510_s8, %s1163_s29  ;;  %p1165_p5 = pneg %p1503_p0 }
  0x46   : > { %s1168_s13 = scalar_lea.hbm %s1693_s0, 4096  ;;  %p1169_p1 = scmp.lt.u32.totalorder %s1510_s8, %s1693_s0 }
  0x47   : > { %p1166_p7 = pnand %p1165_p5, %p1164_p3  ;;  %p1170_p2 = scmp.lt.u32.totalorder %s1168_s13, %s1163_s29 }
  0x48   : > { %p1172_p6 = scmp.lt.u32.totalorder %s1163_s29, %s1510_s8 }
  0x49   : > { %p1167_p9 = pneg %p1166_p7  ;;  %p1171_p4 = por %p1170_p2, %p1169_p1 }
  0x4b   : > { %p1173_p8 = por %p1172_p6, %p1171_p4 }
  0x4d   : > { %p1174_p10 = pnand %p1173_p8, %p1167_p9 }
  0x4f   : > { %1177 = shalt.err (!%p1174_p10)
}
  0x50   : > { %s1178_s15 = scalar_lea.vmem %s1497_s3, 1024  ;;  %s1334_s16 = smov [#allocation2]  }
  0x51   : > { %p1179_p12 = scmp.ne.s32.totalorder %s1497_s3, %s1178_s15  ;;  %s1183_s6 = sshll.u32 %s1334_s16, 4  ;;  %s1184_s6 = int_to_ptr.vmem [resolvable:$false] %s1183_s6 }
  0x52   : > { %s1185_s9 = scalar_lea.vmem %s1184_s6, 2048  ;;  %p1186_p7 = scmp.lt.s32.totalorder %s1497_s3, %s1184_s6 }
  0x53   : > { %p1181_p13 = pnand %p1179_p12, %p1165_p5  ;;  %p1187_p1 = scmp.lt.s32.totalorder %s1185_s9, %s1178_s15 }
  0x55   : > { %p1182_p3 = pneg %p1181_p13  ;;  %p1188_p2 = por %p1187_p1, %p1186_p7 }
  0x57   : > { %p1189_p4 = pnand %p1188_p2, %p1182_p3 }
  0x59   : > { %1192 = shalt.err (!%p1189_p4)
}
  0x5a   : > { %1051 = dma.hbm_to_vmem [thread:$0]  (!%p1503_p0), %s1510_s8, 1024, %s1497_s3, %s221_s27  }
  0x5b   : > { %s983_s29 = sshll.u32 %s1325_s24, 3  ;;  %s245_s12 = scalar_lea.vmem [#allocation5], %s982_s17 }
  0x5c   : > { %s253_s11 = sshll.u32 %s245_s12, 4  ;;  %s250_s13 = sadd.s32 %s1321_s23, %s983_s29  ;;  %s1543_s11 = int_to_ptr.vmem [resolvable:$true] %s253_s11 }
  0x5d   : > { %s984_s18 = sshll.u32 %s250_s13, 7  ;;  %s241_s7 = sand.u32 1, %s1329_s25  }
  0x5e   : > { %s1549_s6 = scalar_lea.hbm %s1694_s1, %s984_s18  ;;  %s1551_s9 = scalar_lea.sflag [#allocation6], %s241_s7 }
  0x5f   : > { %s1193_s3 = scalar_lea.hbm %s1549_s6, 512  ;;  %s1198_s17 = scalar_lea.hbm %s1694_s1, 2048 }
  0x60   : > { %p1194_p9 = scmp.ne.s32.totalorder %s1549_s6, %s1193_s3  ;;  %p1199_p10 = scmp.lt.u32.totalorder %s1549_s6, %s1694_s1 }
  0x61   : > { %p1200_p12 = scmp.lt.u32.totalorder %s1198_s17, %s1193_s3  ;;  %p1202_p3 = scmp.lt.u32.totalorder %s1193_s3, %s1549_s6 }
  0x62   : > { %p1196_p6 = pnand %p1194_p9, %p1165_p5 }
  0x63   : > { %p1201_p13 = por %p1200_p12, %p1199_p10 }
  0x64   : > { %p1197_p8 = pneg %p1196_p6 }
  0x65   : > { %p1203_p7 = por %p1202_p3, %p1201_p13 }
  0x67   : > { %p1204_p1 = pnand %p1203_p7, %p1197_p8 }
  0x69   : > { %1207 = shalt.err (!%p1204_p1)
}
  0x6a   : > { %s1208_s12 = scalar_lea.vmem %s1543_s11, 512  ;;  %s1335_s13 = smov [#allocation5]  }
  0x6b   : > { %p1209_p2 = scmp.ne.s32.totalorder %s1543_s11, %s1208_s12  ;;  %s1213_s18 = sshll.u32 %s1335_s13, 4  ;;  %s1214_s18 = int_to_ptr.vmem [resolvable:$false] %s1213_s18 }
  0x6c   : > { %s1215_s7 = scalar_lea.vmem %s1214_s18, 1024  ;;  %p1216_p6 = scmp.lt.s32.totalorder %s1543_s11, %s1214_s18 }
  0x6d   : > { %p1211_p4 = pnand %p1209_p2, %p1165_p5  ;;  %p1217_p10 = scmp.lt.s32.totalorder %s1215_s7, %s1208_s12 }
  0x6f   : > { %p1212_p9 = pneg %p1211_p4  ;;  %p1218_p12 = por %p1217_p10, %p1216_p6 }
  0x71   : > { %p1219_p13 = pnand %p1218_p12, %p1212_p9 }
  0x73   : > { %1222 = shalt.err (!%p1219_p13)
}
  0x74   : > { %s1336_s15 = smov 256   ;;  %s1727_s16 = smov 8  }
  0x75   : > { %s1728_s3 = smov 128   ;;  %p1729_p5 = scmp.ne.s32.totalorder %s1717_s30, 0 }
  0x76   : > { %1054 = dma.hbm_to_vmem [thread:$0]  (!%p1503_p0), %s1549_s6, 512, %s1543_s11, %s1551_s9, %s1336_s15, %s1728_s3, %s1727_s16  }
  0x77   : > { %265 = sbr.rel (%p1729_p5) target bundleno = 392 (0x188), region = 40  ;;  %s1582_s14 = sand.u32 (!%p1729_p5), 1, %s1305_s19  }
  0x78   : > { %s986_s8 = sshll.u32 (!%p1729_p5), %s1582_s14, 6  ;;  %s268_s17 = scalar_lea.sflag (!%p1729_p5), [#allocation3], %s1582_s14 }
  0x79   : > { %s1586_s27 = scalar_lea.vmem (!%p1729_p5), [#allocation2], %s986_s8  ;;  %p1730_p8 = scmp.ne.s32.totalorder (!%p1729_p5), %s1714_s28, 0 }
  0x7e   : > { %1284 = dma.done.wait (%p1730_p8), %s268_s17, 1024  }
  0x7f   : > { %1286 = vsyncadd (%p1730_p8), %s268_s17, 4294966272  ;;  %s276_s5 = sand.u32 1, %s1412_s26   ;;  %s987_s30 = sshll.u32 %s1582_s14, 5 }
  0x80   : > { %s277_s11 = scalar_lea.sflag [#allocation6], %s276_s5  ;;  %s1596_s6 = scalar_lea.vmem [#allocation5], %s987_s30 }
  0x81   : > { %1288 = dma.done.wait (%p1730_p8), %s277_s11, 512  }
  0x82   : > { %1290 = vsyncadd (%p1730_p8), %s277_s11, 4294966784  ;;  %p1731_p0 = scmp.eq.s32.totalorder %s1412_s26, 0 }
  0x84   : > { %1292 = dma.done.wait (%p1731_p0), [#allocation6], 512   ;;  %p1732_p3 = pmov %p1731_p0 }
  0x85   : > { %v1337_v0 = vmov 0.0   ;;  %v1338_v1 = vmov 0   ;;  %vm335_vm0 = vcmask 261120   ;;  %v331_v2 = vld [vmem:[#allocation7] sm:$0xff]  ;;  %v332_v3 = vld [vmem:[#allocation7 + $0x8] sm:$0xff]  ;;  %v333_v4 = vld [vmem:[#allocation7 + $0x10] sm:$0xff]  ;;  %v444_v26 = vlaneseq }
  0x86   : > { %1294 = vsyncadd (%p1732_p3), [#allocation6], 4294966784  ;;  %581 = vmatprep.mubr.f32.mxu1 %v1337_v0  ;;  %1134 = vset.pattern.permute.xlu0 %v1338_v1  ;;  %v1026_v5 = vpack.c.bf16 %v332_v3, %v331_v2  ;;  %v334_v6 = vld [vmem:[#allocation7 + $0x18] sm:$0xff]  ;;  %v327_v7 = vld [vmem:[%s1596_s6] sm:$0xff]  ;;  %vm513_vm1 = vcmask 64512   ;;  %s999_s12 = sshll.u32 %s1313_s21, 3 }
  0x87   : > { %v320_v8 = vld [vmem:[%s1586_s27 + $0x8] sm:$0xff]  ;;  %v1030_v9 = vpack.c.bf16 %v334_v6, %v333_v4  ;;  %1020 = vmatprep.mubr.msk.f32.mxu0 %vm335_vm0, %v327_v7  ;;  %v319_v10 = vld [vmem:[%s1586_s27] sm:$0xff]  ;;  %v322_v12 = vld [vmem:[%s1586_s27 + $0x18] sm:$0xff]  ;;  %v1339_v24 = vmov 1966171168   ;;  %v445_v31 = vshrl.u32 %v444_v26, 7 }
  0x88   : > { %517 = vmatprep.subr.mxu1 %v320_v8  ;;  %v318_v11 = vld [vmem:[%s1695_s2] sm:$0xf]  ;;  %1027 = vmatprep.subr.bf16.mxu0 %v1026_v5  ;;  %v321_v13 = vld [vmem:[%s1586_s27 + $0x10] sm:$0xff]  ;;  %v324_v14 = vld [vmem:[%s1586_s27 + $0x28] sm:$0xff]  ;;  %v442_v25 = vunpack.c.l.s4 %v1339_v24  ;;  %s1000_s13 = sshll.u32 %s1317_s22, 4  ;;  %s315_s22 = scalar_lea.vmem [#allocation8], %s987_s30 }
  0x89   : > { %518 = vmatpush1.msra.mxu1 %v319_v10  ;;  %1029 = vmatpush3.bf16.msra.mxu0 %v1026_v5  ;;  %v801_v15 = vld [vmem:[%s1697_s4] sm:$0xf]  ;;  %v326_v17 = vld [vmem:[%s1586_s27 + $0x38] sm:$0xff]  ;;  %v328_v18 = vld [vmem:[%s1596_s6 + $0x8] sm:$0xff]  ;;  %s848_s18 = sadd.s32 %s1000_s13, %s999_s12  ;;  %s852_s15 = sshll.u32 %s315_s22, 4  ;;  %s1641_s15 = int_to_ptr.vmem [resolvable:$true] %s852_s15 }
  0x8a   : > { %994 = vmatmul.mubr.msk.f32.vlgmr.msra.gmra.mrb[0].mxu1 %vm513_vm1, %v318_v11  ;;  %1031 = vmatprep.subr.bf16.mxu0 %v1030_v9  ;;  %v323_v16 = vld [vmem:[%s1586_s27 + $0x20] sm:$0xff]  ;;  %v329_v19 = vld [vmem:[%s1596_s6 + $0x10] sm:$0xff]  ;;  %v330_v21 = vld [vmem:[%s1596_s6 + $0x18] sm:$0xff]  ;;  %v443_v30 = vunpack.c.0.s8 %v442_v25  ;;  %s1001_s21 = sshll.u32 %s848_s18, 6  ;;  %s1734_s8 = sld [smem:[#allocation19_spill]] }
  0x8b   : > { %588 = vmatprep.subr.mxu1 %v322_v12  ;;  %652 = vmatprep.mubr.f32.mxu1 %v1337_v0  ;;  %v325_v20 = vld [vmem:[%s1586_s27 + $0x30] sm:$0xff]  ;;  %s836_s27 = scalar_lea.sflag [#allocation4], %s1582_s14  ;;  %s1223_s5 = scalar_lea.vmem %s1641_s15, 512 }
  0x8c   : > { %589 = vmatpush1.msra.mxu1 %v321_v13  ;;  %804 = vperm.xlu0 %1134, %v801_v15   ;;  %v446_v37 = vsub.s32 %v443_v30, %v445_v31  ;;  %p1224_p7 = scmp.ne.s32.totalorder %s1641_s15, %s1223_s5  ;;  %s1340_s30 = smov [#allocation8]  }
  0x8d   : > { %659 = vmatprep.subr.mxu1 %v324_v14  ;;  %1033 = vmatpush3.bf16.msra.mxu0 %v1030_v9  ;;  %s1227_s11 = sshll.u32 %s1340_s30, 4  ;;  %s1228_s11 = int_to_ptr.vmem [resolvable:$false] %s1227_s11 }
  0x8e   : > { %995 = vmatmul.mubr.msk.f32.vlgmr.msra.gmra.mrb[2].mxu1 %vm513_vm1, %v318_v11  ;;  %p1225_p1 = pnand %p1224_p7, %p1475_p11  ;;  %s1229_s6 = scalar_lea.vmem %s1228_s11, 1024 }
  0x8f   : > { %660 = vmatpush1.msra.mxu1 %v323_v16  ;;  %723 = vmatprep.mubr.f32.mxu1 %v1337_v0  ;;  %p1230_p4 = scmp.lt.s32.totalorder %s1641_s15, %s1228_s11  ;;  %p1231_p9 = scmp.lt.s32.totalorder %s1229_s6, %s1223_s5 }
  0x90   : > { %730 = vmatprep.subr.mxu1 %v326_v17  ;;  %1021 = vmatmul.mubr.msk.f32.vlgmr.msra.gmra.mrb[0].mxu0 %vm335_vm0, %v328_v18  ;;  %s1639_s17 = scalar_lea.hbm %s1734_s8, %s1001_s21  ;;  %p1226_p2 = pneg %p1225_p1 }
  0x91   : > { %1023 = vmatprep.mubr.msk.f32.mxu0 %vm335_vm0, %v329_v19  ;;  %p1232_p6 = por %p1231_p9, %p1230_p4 }
  0x92   : > { %996 = vmatmul.mubr.msk.f32.vlgmr.msra.gmra.mrb[4].mxu1 %vm513_vm1, %v318_v11 }
  0x93   : > { %731 = vmatpush1.msra.mxu1 %v325_v20  ;;  %794 = vmatprep.mubr.f32.mxu1 %v1337_v0  ;;  %p1233_p10 = pnand %p1232_p6, %p1226_p2 }
  0x94   : > { %1024 = vmatmul.mubr.msk.f32.gmra.mrb[2].mxu0 %vm335_vm0, %v330_v21 }
  0x96   : > { %997 = vmatmul.mubr.msk.f32.vlgmr.msra.gmra.mrb[6].mxu1 %vm513_vm1, %v318_v11 }
 0x10b   : > { %v805_v56 = vpop.permute.xlu0 %804 }
 0x15d   : > { %v583_v22 = vpop.f32.mrb[0].mxu1 }
 0x15e   : > { %v585_v23 = vpop.f32.mrb[1].mxu1 }
 0x161   : > { %v654_v27 = vpop.f32.mrb[2].mxu1 }
 0x162   : > { %v656_v28 = vpop.f32.mrb[3].mxu1 }
 0x163   : > { %v1022_v29 = vpop.f32.mrb[0].mxu0 }
 0x164   : > { %v414_v32 = vpop.f32.mrb[1].mxu0 }
 0x165   : > { %v725_v33 = vpop.f32.mrb[4].mxu1  ;;  %v437_v34 = vcombine.low %v414_v32, %v1022_v29  ;;  %v438_v35 = vcombine.high %v414_v32, %v1022_v29 }
 0x166   : > { %v727_v36 = vpop.f32.mrb[5].mxu1 }
 0x167   : > { %v1025_v38 = vpop.f32.mrb[2].mxu0  ;;  %v447_v44 = vrot.slane %v437_v34, %v446_v37  ;;  %v454_v45 = vrot.slane %v438_v35, %v446_v37 }
 0x168   : > { %v424_v39 = vpop.f32.mrb[3].mxu0 }
 0x169   : > { %v796_v40 = vpop.f32.mrb[6].mxu1  ;;  %v439_v41 = vcombine.low %v424_v39, %v1025_v38  ;;  %v440_v42 = vcombine.high %v424_v39, %v1025_v38 }
 0x16a   : > { %v798_v43 = vpop.f32.mrb[7].mxu1 }
 0x16b   : > { %v461_v46 = vrot.slane %v439_v41, %v446_v37  ;;  %v468_v47 = vrot.slane %v440_v42, %v446_v37 }
 0x16d   : > { %v469_v48 = vcombine.low %v447_v44, %v461_v46  ;;  %v470_v49 = vcombine.high %v447_v44, %v461_v46  ;;  %v471_v50 = vcombine.low %v454_v45, %v468_v47  ;;  %v472_v51 = vcombine.high %v454_v45, %v468_v47 }
 0x16f   : > { %v479_v52 = vrot.slane %v469_v48, %v446_v37  ;;  %v493_v53 = vrot.slane %v470_v49, %v446_v37  ;;  %v486_v54 = vrot.slane %v471_v50, %v446_v37  ;;  %v500_v55 = vrot.slane %v472_v51, %v446_v37 }
 0x171   : > { %v501_v57 = vcombine.high %v479_v52, %v479_v52  ;;  %v584_v58 = vadd.f32 %v583_v22, %v479_v52  ;;  %v503_v59 = vcombine.high %v493_v53, %v493_v53  ;;  %v586_v60 = vadd.f32 %v585_v23, %v493_v53 }
 0x172   : > { %v726_v61 = vadd.f32 %v725_v33, %v486_v54  ;;  %v728_v62 = vadd.f32 %v727_v36, %v500_v55  ;;  %v502_v63 = vcombine.high %v486_v54, %v486_v54  ;;  %v504_v0 = vcombine.high %v500_v55, %v500_v55 }
 0x173   : > { %v655_v1 = vadd.f32 %v654_v27, %v501_v57  ;;  %v657_v2 = vadd.f32 %v656_v28, %v503_v59  ;;  %v807_v3 = vadd.f32 %v805_v56, %v584_v58  ;;  %v808_v4 = vadd.f32 %v805_v56, %v586_v60 }
 0x174   : > { %v797_v5 = vadd.f32 %v796_v40, %v502_v63  ;;  %v799_v6 = vadd.f32 %v798_v43, %v504_v0  ;;  %v811_v7 = vadd.f32 %v805_v56, %v726_v61  ;;  %v812_v8 = vadd.f32 %v805_v56, %v728_v62 }
 0x175   : > { %v809_v9 = vadd.f32 %v805_v56, %v655_v1  ;;  %v810_v10 = vadd.f32 %v805_v56, %v657_v2  ;;  %v823_v11 = vcombine.low %v807_v3, %v808_v4 }
 0x176   : > { %v813_v12 = vadd.f32 %v805_v56, %v797_v5  ;;  %v814_v13 = vadd.f32 %v805_v56, %v799_v6  ;;  %v825_v14 = vcombine.low %v811_v7, %v812_v8 }
 0x177   : > { %v824_v15 = vcombine.low %v809_v9, %v810_v10  ;;  %831 = vst [vmem:[%s315_s22] sm:$0xff] %v823_v11 }
 0x178   : > { %v826_v16 = vcombine.low %v813_v12, %v814_v13  ;;  %833 = vst [vmem:[%s315_s22 + $0x10] sm:$0xff] %v825_v14 }
 0x179   : > { %832 = vst [vmem:[%s315_s22 + $0x8] sm:$0xff] %v824_v15 }
 0x17a   : > { %834 = vst [vmem:[%s315_s22 + $0x18] sm:$0xff] %v826_v16 }
 0x17b   : > { %1236 = shalt.err (!%p1233_p10)
}
 0x17c   : > { %s1237_s14 = scalar_lea.hbm %s1639_s17, 512  ;;  %s1241_s9 = scalar_lea.hbm %s1734_s8, 2048 }
 0x17d   : > { %p1238_p12 = scmp.ne.s32.totalorder %s1639_s17, %s1237_s14  ;;  %p1242_p8 = scmp.lt.u32.totalorder %s1639_s17, %s1734_s8 }
 0x17e   : > { %p1243_p0 = scmp.lt.u32.totalorder %s1241_s9, %s1237_s14  ;;  %p1245_p7 = scmp.lt.u32.totalorder %s1237_s14, %s1639_s17 }
 0x17f   : > { %p1239_p13 = pnand %p1238_p12, %p1475_p11 }
 0x180   : > { %p1244_p3 = por %p1243_p0, %p1242_p8 }
 0x181   : > { %p1240_p5 = pneg %p1239_p13 }
 0x182   : > { %p1246_p1 = por %p1245_p7, %p1244_p3 }
 0x184   : > { %p1247_p2 = pnand %p1246_p1, %p1240_p5 }
 0x186   : > { %1250 = shalt.err (!%p1247_p2)
}
 0x187   : > { %1042 = dma.vmem_to_hbm [thread:$0]  (%p1475_p11), %s1641_s15, 512, %s1639_s17, %s836_s27  }
 0x188 PF: > { %s1735_s13 = sld [smem:[#allocation13_spill]]  ;;  %s1736_s18 = sld [smem:[#allocation14_spill]] }
 0x189   : > { %p1062_p4 = scmp.ge.s32.totalorder %s1329_s25, 2 }
 0x18e   : > { %s864_s21 = sand.u32 1, %s1735_s13   ;;  %p1737_p9 = scmp.ne.s32.totalorder %s1736_s18, 0 }
 0x18f   : > { %s865_s22 = scalar_lea.sflag [#allocation4], %s864_s21 }
 0x190   : > { %p1056_p6 = pnand %p1062_p4, %p1737_p9 }
 0x192   : > { %1296 = dma.done.wait (!%p1056_p6), %s865_s22, 512  }
 0x193   : > { %1298 = vsyncadd (!%p1056_p6), %s865_s22, 4294966784  ;;  %s24_s25 = sadd.s32 1, %s1329_s25   ;;  %s1738_s7 = sld [smem:[#allocation15_spill]] }
 0x194   : > { %p21_p10 = scmp.ge.s32.totalorder %s24_s25, 6   ;;  %s1739_s15 = sld [smem:[#allocation17_spill]] }
 0x195   : > { %s1740_s18 = smov %s1305_s19  ;;  %s1741_s19 = smov %s1309_s20 }
 0x196   : > { %s1742_s20 = smov %s1495_s10  ;;  %s1743_s21 = smov %s1321_s23 }
 0x197   : > { %s1744_s22 = smov %s1325_s24  ;;  %23 = sbr.rel (!%p21_p10) target bundleno = 12 (0xc), region = 102 }
 0x199   : > { %s1745_s23 = smov %s1738_s7 }
 0x19a   : > { %s1746_s24 = smov %s1739_s15 }
 0x19e   :  { %870 = vsyncpa [#allocation3], 1 }
 0x19f   :  { %872 = vsyncpa [#allocation3 + $0x1], 1 }
 0x1a0   :  { %873 = vsyncpa [#allocation6], 1 }
 0x1a1   :  { %875 = vsyncpa [#allocation6 + $0x1], 1 }
 0x1a2   :  { %876 = vsyncpa [#allocation4], 1 }
 0x1a3   :  { %878 = vsyncpa [#allocation4 + $0x1], 1 }

</bundles_post_ra>
